<compile_context>
chip_gen: v7x
topology: tpu7x:2x2x1
jax: 0.10.0
libtpu: 0.0.40
codegen_flags: <defaults>
</compile_context>

<pallas_src>
import functools

import jax
import jax.numpy as jnp
from jax import lax
from jax.experimental import pallas as pl
from jax.experimental.pallas import tpu as pltpu


def _bpr_kernel(pos_ref, neg_ref, out_ref, acc_ref, *,
                tile_b, blocks_per_split, total_rows, needs_mask):
    j = pl.program_id(1)  # row-block axis within the split (reduction axis)

    @pl.when(j == 0)
    def _():
        acc_ref[...] = jnp.zeros_like(acc_ref)

    # Elementwise hot path: x = neg - pos ; numerically stable softplus(x).
    x = neg_ref[...].astype(jnp.float32) - pos_ref[...].astype(jnp.float32)

    if needs_mask:
        # Un-clamped block index: padded / clamped grid steps land entirely past
        # total_rows and are zeroed out below.
        block_idx = pl.program_id(0) * blocks_per_split + j
        rows = block_idx * tile_b + lax.broadcasted_iota(jnp.int32, x.shape, 0)
        valid = rows < total_rows
        x = jnp.where(valid, x, 0.0)            # keep garbage out of exp/log1p
        sp = jnp.maximum(x, 0.0) + jnp.log1p(jnp.exp(-jnp.abs(x)))
        sp = jnp.where(valid, sp, 0.0)          # softplus(0)=log 2 -> zero it
    else:
        sp = jnp.maximum(x, 0.0) + jnp.log1p(jnp.exp(-jnp.abs(x)))

    # Fold the tile into 8 partial sublane rows (pure VALU vreg adds); defer the
    # 8->1 sublane + cross-lane reduce to the epilogue.
    acc_ref[...] += jnp.sum(sp.reshape(-1, 8, sp.shape[-1]), axis=0)

    @pl.when(j == pl.num_programs(1) - 1)
    def _():
        out_ref[...] = jnp.sum(acc_ref[...], keepdims=True)


def _chip_config():
    """Returns (num_splits, target_block_bytes, vmem_cap_bytes, core_parallel)."""
    kind = ""
    try:
        kind = jax.devices()[0].device_kind.lower()
    except Exception:
        pass
    if "7" in kind:
        # v7x: 2 TensorCores per chip, but only 64 MiB VMEM per TC.
        return 2, 4 << 20, 48 << 20, True
    if "v6" in kind or "v5" in kind:
        # Single TensorCore, 128 MiB VMEM: bigger tiles, no split.
        return 1, 8 << 20, 96 << 20, False
    # Unknown / older generation: conservative settings.
    return 1, 4 << 20, 48 << 20, False


def bpr_loss(pos_preds: jax.Array, neg_preds: jax.Array) -> jax.Array:
    """Averaged BPR loss: mean(softplus(neg - pos)), computed in one Pallas kernel."""
    assert pos_preds.shape == neg_preds.shape
    total_elems = pos_preds.size

    # Normalize to 2-D (row-major collapse of leading dims is layout-free).
    if pos_preds.ndim == 2:
        pos2d, neg2d = pos_preds, neg_preds
    elif pos_preds.ndim > 2:
        pos2d = pos_preds.reshape(-1, pos_preds.shape[-1])
        neg2d = neg_preds.reshape(-1, neg_preds.shape[-1])
    else:  # 1-D vector of scores
        pos2d = pos_preds.reshape(1, -1)
        neg2d = neg_preds.reshape(1, -1)

    B, N = pos2d.shape
    itemsize = jnp.dtype(pos2d.dtype).itemsize

    num_splits, target_block_bytes, vmem_cap, core_parallel = _chip_config()

    # Sublane multiple for the input dtype (8 f32 / 16 bf16 / 32 int8-fp8).
    sublane = max(8, 32 // itemsize)

    # Row tile: ~target_block_bytes per input block, a sublane multiple, but
    # never larger than the (sublane-rounded) batch itself.
    rows_for_budget = max(
        sublane, (target_block_bytes // (N * itemsize)) // sublane * sublane)
    rows_needed = ((B + sublane - 1) // sublane) * sublane
    tile_b = int(min(rows_for_budget, rows_needed))

    total_blocks = pl.cdiv(B, tile_b)
    num_splits = int(min(num_splits, total_blocks))
    blocks_per_split = pl.cdiv(total_blocks, num_splits)
    last_block = total_blocks - 1
    padded_blocks = num_splits * blocks_per_split != total_blocks
    needs_mask = (B % tile_b != 0) or padded_blocks

    if padded_blocks:
        def in_index_map(c, j):
            # Clamp fully out-of-range tail steps to the last real block; their
            # contribution is zeroed by the (un-clamped) row mask in the kernel.
            return (jnp.minimum(c * blocks_per_split + j, last_block), 0)
    else:
        def in_index_map(c, j):
            return (c * blocks_per_split + j, 0)

    kernel = functools.partial(
        _bpr_kernel,
        tile_b=tile_b,
        blocks_per_split=blocks_per_split,
        total_rows=B,
        needs_mask=needs_mask,
    )

    # 2 inputs x 2 pipeline buffers x block, plus headroom; capped per-chip so
    # the request stays inside physical VMEM (64 MiB per TC on v7x).
    block_bytes = tile_b * N * itemsize
    vmem_limit = int(min(4 * block_bytes + (16 << 20), vmem_cap))

    def _call(dim_semantics):
        return pl.pallas_call(
            kernel,
            out_shape=jax.ShapeDtypeStruct((num_splits, 1), jnp.float32),
            grid_spec=pltpu.PrefetchScalarGridSpec(
                num_scalar_prefetch=0,
                grid=(num_splits, blocks_per_split),
                in_specs=[
                    pl.BlockSpec((tile_b, N), in_index_map),
                    pl.BlockSpec((tile_b, N), in_index_map),
                ],
                out_specs=pl.BlockSpec((1, 1), lambda c, j: (c, 0)),
                scratch_shapes=[pltpu.VMEM((8, N), jnp.float32)],
            ),
            compiler_params=pltpu.CompilerParams(
                dimension_semantics=dim_semantics,
                vmem_limit_bytes=vmem_limit,
            ),
        )(pos2d, neg2d)

    arbitrary = getattr(pltpu, "ARBITRARY", "arbitrary")
    if core_parallel and num_splits > 1:
        core_par = getattr(pltpu, "CORE_PARALLEL", "parallel")
        try:
            partial_sums = _call((core_par, arbitrary))
        except Exception:
            # Fallback if CORE_PARALLEL is rejected by this toolchain/chip.
            partial_sums = _call(("parallel", "arbitrary"))
    else:
        partial_sums = _call((arbitrary, arbitrary))

    return jnp.sum(partial_sums) / total_elems


if __name__ == "__main__":
    key = jax.random.PRNGKey(0)
    k1, k2 = jax.random.split(key)

    # Small shapes consistent with the module: per-interaction prediction scores.
    B, N = 16, 128
    pos_preds = jax.random.normal(k1, (B, N), dtype=jnp.float32)
    neg_preds = jax.random.normal(k2, (B, N), dtype=jnp.float32)

    loss = bpr_loss(pos_preds, neg_preds)
    jax.block_until_ready(loss)

    # Reference: same math as torch.nn.Softplus()(-(pos - neg)).mean()
    ref = jnp.mean(jax.nn.softplus(-(pos_preds - neg_preds)))
    assert jnp.allclose(loss, ref, rtol=1e-5, atol=1e-6), (loss, ref)

    print("KERNEL_OK")
</pallas_src>

<mosaic_0001>
module attributes {stable_mosaic.version = 11 : i64} {
  func.func @_bpr_kernel(%arg0: i32, %arg1: i32, %arg2: memref<16x128xf32, #tpu.memory_space<vmem>>, %arg3: memref<16x128xf32, #tpu.memory_space<vmem>>, %arg4: memref<1x1xf32, #tpu.memory_space<vmem>>, %arg5: memref<8x128xf32, #tpu.memory_space<vmem>>) attributes {dimension_semantics = [#tpu.dimension_semantics<arbitrary>, #tpu.dimension_semantics<arbitrary>], iteration_bounds = array<i64: 1, 1>, scalar_prefetch = 0 : i64, scratch_operands = 1 : i64, tpu.core_type = #tpu.core_type<tc>, window_params = [{transform_indices = @transform_0, window_bounds = array<i64: 16, 128>}, {transform_indices = @transform_1, window_bounds = array<i64: 16, 128>}, {transform_indices = @transform_2, window_bounds = array<i64: 1, 1>}]} {
    %c0_i32 = arith.constant 0 : i32
    %0 = arith.cmpi eq, %arg1, %c0_i32 : i32
    %1 = arith.extui %0 : i1 to i32
    %c0_i32_0 = arith.constant 0 : i32
    %2 = arith.cmpi ne, %1, %c0_i32_0 : i32
    scf.if %2 {
      %cst_12 = arith.constant 0.000000e+00 : f32
      %22 = vector.broadcast %cst_12 : f32 to vector<8x128xf32>
      %c0_13 = arith.constant 0 : index
      %c0_14 = arith.constant 0 : index
      %23 = vector.load %arg5[%c0_13, %c0_14] : memref<8x128xf32, #tpu.memory_space<vmem>>, vector<8x128xf32>
      tpu.vector_store %arg5[%c0_13, %c0_14], %22 {strides = array<i32>} : memref<8x128xf32, #tpu.memory_space<vmem>>, vector<8x128xf32>,
    } else {
    }
    %c0 = arith.constant 0 : index
    %c0_1 = arith.constant 0 : index
    %3 = vector.load %arg3[%c0, %c0_1] : memref<16x128xf32, #tpu.memory_space<vmem>>, vector<16x128xf32>
    %c0_2 = arith.constant 0 : index
    %c0_3 = arith.constant 0 : index
    %4 = vector.load %arg2[%c0_2, %c0_3] : memref<16x128xf32, #tpu.memory_space<vmem>>, vector<16x128xf32>
    %5 = arith.subf %3, %4 : vector<16x128xf32>
    %cst = arith.constant 0.000000e+00 : f32
    %6 = vector.broadcast %cst : f32 to vector<16x128xf32>
    %7 = arith.maximumf %5, %6 : vector<16x128xf32>
    %8 = math.absf %5 : vector<16x128xf32>
    %cst_4 = arith.constant 0.000000e+00 : f32
    %9 = vector.broadcast %cst_4 : f32 to vector<16x128xf32>
    %10 = arith.subf %9, %8 : vector<16x128xf32>
    %11 = math.exp %10 : vector<16x128xf32>
    %12 = math.log1p %11 : vector<16x128xf32>
    %13 = arith.addf %7, %12 : vector<16x128xf32>
    %c0_5 = arith.constant 0 : index
    %c0_6 = arith.constant 0 : index
    %14 = vector.load %arg5[%c0_5, %c0_6] : memref<8x128xf32, #tpu.memory_space<vmem>>, vector<8x128xf32>
    %15 = vector.shape_cast %13 : vector<16x128xf32> to vector<2x8x128xf32>
    %cst_7 = arith.constant dense<0.000000e+00> : vector<8x128xf32>
    %16 = vector.multi_reduction <add>, %15, %cst_7 [0] : vector<2x8x128xf32> to vector<8x128xf32>
    %17 = arith.addf %14, %16 : vector<8x128xf32>
    %c0_8 = arith.constant 0 : index
    %c0_9 = arith.constant 0 : index
    %18 = vector.load %arg5[%c0_8, %c0_9] : memref<8x128xf32, #tpu.memory_space<vmem>>, vector<8x128xf32>
    tpu.vector_store %arg5[%c0_8, %c0_9], %17 {strides = array<i32>} : memref<8x128xf32, #tpu.memory_space<vmem>>, vector<8x128xf32>,
    %c0_i32_10 = arith.constant 0 : i32
    %19 = arith.cmpi eq, %arg1, %c0_i32_10 : i32
    %20 = arith.extui %19 : i1 to i32
    %c0_i32_11 = arith.constant 0 : i32
    %21 = arith.cmpi ne, %20, %c0_i32_11 : i32
    scf.if %21 {
      %c0_12 = arith.constant 0 : index
      %c0_13 = arith.constant 0 : index
      %22 = vector.load %arg5[%c0_12, %c0_13] : memref<8x128xf32, #tpu.memory_space<vmem>>, vector<8x128xf32>
      %23 = vector.shape_cast %22 : vector<8x128xf32> to vector<1x8x128xf32>
      %cst_14 = arith.constant dense<0.000000e+00> : vector<1xf32>
      %24 = vector.multi_reduction <add>, %23, %cst_14 [1, 2] : vector<1x8x128xf32> to vector<1xf32>
      %25 = vector.shape_cast %24 : vector<1xf32> to vector<1x1x1xf32>
      %26 = vector.extract %25[0, 0, 0] : f32 from vector<1x1x1xf32>
      %27 = vector.broadcast %26 : f32 to vector<1x1xf32>
      %c0_15 = arith.constant 0 : index
      %c0_16 = arith.constant 0 : index
      %28 = vector.load %arg4[%c0_15, %c0_16] : memref<1x1xf32, #tpu.memory_space<vmem>>, vector<1x1xf32>
      tpu.vector_store %arg4[%c0_15, %c0_16], %27 {strides = array<i32>} : memref<1x1xf32, #tpu.memory_space<vmem>>, vector<1x1xf32>,
    } else {
    }
    return
  }
  func.func @transform_0(%arg0: i32, %arg1: i32) -> (i32, i32) {
    %c1_i32 = arith.constant 1 : i32
    %0 = arith.muli %arg0, %c1_i32 : i32
    %1 = arith.addi %0, %arg1 : i32
    %c0_i32 = arith.constant 0 : i32
    %c0_i32_0 = arith.constant 0 : i32
    return %1, %c0_i32 : i32, i32
  }
  func.func @transform_1(%arg0: i32, %arg1: i32) -> (i32, i32) {
    %c1_i32 = arith.constant 1 : i32
    %0 = arith.muli %arg0, %c1_i32 : i32
    %1 = arith.addi %0, %arg1 : i32
    %c0_i32 = arith.constant 0 : i32
    %c0_i32_0 = arith.constant 0 : i32
    return %1, %c0_i32 : i32, i32
  }
  func.func @transform_2(%arg0: i32, %arg1: i32) -> (i32, i32) {
    %c0_i32 = arith.constant 0 : i32
    %c0_i32_0 = arith.constant 0 : i32
    return %arg0, %c0_i32 : i32, i32
  }
}

</mosaic_0001>

<bundles_post_ra>
// kernel: tpu_custom_call.1
= control target key start
LH: loop header
LB: loop body
LE: loop exit
PB: predicated region body
PF: predicated region fallthrough
CT: control target
= control target key end

     0   :  { %7 = vsyncpa [#allocation4], 0  ;;  %s272_s0 = inlined_call_operand.hbm [shape: f32[16,128], index: 0, kind: input, shape index: {}]   ;;  %s273_s1 = inlined_call_operand.hbm [shape: f32[16,128], index: 1, kind: input, shape index: {}]   ;;  %s274_s2 = inlined_call_operand.hbm [shape: f32[1,1], index: 2, kind: output, shape index: {}]  }
   0x1   :  { %8 = vsyncpa [#allocation7], 0 }
   0x2   :  { %9 = vsyncpa [#allocation5], 0  ;;  %s216_s9 = smov [#allocation3]   ;;  %s144_s13 = scalar_lea.hbm %s272_s0, 256 }
   0x3   :  { %s19_s10 = sshll.u32 %s216_s9, 4  ;;  %p145_p0 = scmp.ne.s32.totalorder %s272_s0, %s144_s13  ;;  %s20_s10 = int_to_ptr.vmem [resolvable:$true] %s19_s10 }
   0x4   :  { %p148_p1 = scmp.lt.u32.totalorder %s144_s13, %s272_s0 }
   0x6   :  { %p150_p2 = pnand %p148_p1, %p145_p0 }
   0x8   :  { %153 = shalt.err (!%p150_p2)
}
   0x9   :  { %s154_s18 = scalar_lea.vmem %s20_s10, 256  ;;  %p159_p4 = scmp.lt.s32.totalorder %s20_s10, %s20_s10 }
   0xa   :  { %p155_p3 = scmp.ne.s32.totalorder %s20_s10, %s154_s18  ;;  %p160_p5 = scmp.lt.s32.totalorder %s154_s18, %s154_s18 }
   0xc   :  { %p161_p6 = por %p160_p5, %p159_p4 }
   0xe   :  { %p162_p7 = pnand %p161_p6, %p155_p3 }
  0x10   :  { %165 = shalt.err (!%p162_p7)
}
  0x11   :  { %s217_s19 = smov 128   ;;  %s218_s20 = smov 8  }
  0x12   :  { %25 = dma.hbm_to_vmem [thread:$0]  %s272_s0, 256, %s20_s10, [#allocation4], %s217_s19, %s217_s19, %s218_s20  }
  0x13   :  { %s219_s23 = smov [#allocation6]   ;;  %s166_s27 = scalar_lea.hbm %s273_s1, 256 }
  0x14   :  { %s35_s24 = sshll.u32 %s219_s23, 4  ;;  %p167_p8 = scmp.ne.s32.totalorder %s273_s1, %s166_s27  ;;  %s36_s24 = int_to_ptr.vmem [resolvable:$true] %s35_s24 }
  0x15   :  { %p170_p9 = scmp.lt.u32.totalorder %s166_s27, %s273_s1 }
  0x17   :  { %p172_p10 = pnand %p170_p9, %p167_p8 }
  0x19   :  { %175 = shalt.err (!%p172_p10)
}
  0x1a   :  { %s176_s4 = scalar_lea.vmem %s36_s24, 256  ;;  %p181_p12 = scmp.lt.s32.totalorder %s36_s24, %s36_s24 }
  0x1b   :  { %p177_p11 = scmp.ne.s32.totalorder %s36_s24, %s176_s4  ;;  %p182_p13 = scmp.lt.s32.totalorder %s176_s4, %s176_s4 }
  0x1d   :  { %p183_p0 = por %p182_p13, %p181_p12 }
  0x1f   :  { %p184_p1 = pnand %p183_p0, %p177_p11 }
  0x21   :  { %187 = shalt.err (!%p184_p1)
}
  0x22   :  { %41 = dma.hbm_to_vmem [thread:$0]  %s273_s1, 256, %s36_s24, [#allocation7], %s217_s19, %s217_s19, %s218_s20  }
  0x23   :  { %210 = dma.done.wait [#allocation4], 256  }
  0x24   :  { %211 = vsyncadd [#allocation4], 4294967040 }
  0x25   :  { %212 = dma.done.wait [#allocation7], 256  }
  0x26   :  { %213 = vsyncadd [#allocation7], 4294967040  ;;  %v57_v0 = vld [vmem:[#allocation6] sm:$0xff]  ;;  %v58_v1 = vld [vmem:[#allocation6 + $0x8] sm:$0xff]  ;;  %s220_s1 = smov [#allocation8]   ;;  %vm111_vm2 = vcmask 0  }
  0x27   :  { %v59_v2 = vld [vmem:[#allocation3] sm:$0xff]  ;;  %v60_v3 = vld [vmem:[#allocation3 + $0x8] sm:$0xff]  ;;  %s119_s6 = sshll.u32 %s220_s1, 4  ;;  %s120_s6 = int_to_ptr.vmem [resolvable:$true] %s119_s6 }
  0x28   :  { %v61_v4 = vsub.f32 %v57_v0, %v59_v2  ;;  %v62_v5 = vsub.f32 %v58_v1, %v60_v3  ;;  %s188_s8 = scalar_lea.vmem %s120_s6, 16  ;;  %s192_s9 = scalar_lea.vmem %s120_s6, 32 }
  0x29   :  { %p189_p2 = scmp.ne.s32.totalorder %s120_s6, %s188_s8  ;;  %p193_p3 = scmp.lt.s32.totalorder %s120_s6, %s120_s6 }
  0x2a   :  { %v65_v6 = vand.u32 2147483647, %v61_v4  ;;  %v66_v7 = vand.u32 2147483647, %v62_v5  ;;  %v63_v24 = vmax.f32 %v61_v4, 0.0  ;;  %v64_v27 = vmax.f32 %v62_v5, 0.0  ;;  %p194_p4 = scmp.lt.s32.totalorder %s192_s9, %s188_s8 }
  0x2c   :  { %v67_v8 = vsub.f32 0.0, %v65_v6  ;;  %v68_v9 = vsub.f32 0.0, %v66_v7  ;;  %p195_p5 = por %p194_p4, %p193_p3 }
  0x2e   :  { %v69_v10 = vmul.f32 1.442695, %v67_v8  ;;  %v71_v11 = vmul.f32 1.442695, %v68_v9  ;;  %p196_p6 = pnand %p195_p5, %p189_p2 }
  0x30   :  { %136 = vpow2.f32 %v69_v10 }
  0x31   :  { %138 = vpow2.f32 %v71_v11 }
  0x3a   :  { %v137_v12 = vpop.eup %136 }
  0x3b   :  { %v139_v13 = vpop.eup %138  ;;  %v73_v14 = vadd.f32 1.0, %v137_v12  ;;  %v76_v16 = vmul.f32 -0.5, %v137_v12  ;;  %v79_v19 = vand.u32 2147483647, %v137_v12 }
  0x3c   :  { %v82_v15 = vadd.f32 1.0, %v139_v13  ;;  %v85_v17 = vmul.f32 -0.5, %v139_v13  ;;  %v88_v21 = vand.u32 2147483647, %v139_v13 }
  0x3d   :  { %140 = vlog2.f32 %v73_v14  ;;  %v77_v18 = vadd.f32 1.0, %v76_v16  ;;  %vm80_vm0 = vcmp.lt.f32.partialorder %v79_v19, 0.0004427343 }
  0x3e   :  { %142 = vlog2.f32 %v82_v15  ;;  %v86_v20 = vadd.f32 1.0, %v85_v17  ;;  %vm89_vm1 = vcmp.lt.f32.partialorder %v88_v21, 0.0004427343 }
  0x3f   :  { %v78_v22 = vmul.f32 %v137_v12, %v77_v18 }
  0x40   :  { %v87_v25 = vmul.f32 %v139_v13, %v86_v20 }
  0x47   :  { %v141_v23 = vpop.eup %140 }
  0x48   :  { %v143_v26 = vpop.eup %142  ;;  %v75_v28 = vmul.f32 0.6931472, %v141_v23 }
  0x49   :  { %v84_v29 = vmul.f32 0.6931472, %v143_v26 }
  0x4a   :  { %v81_v30 = vsel %vm80_vm0, %v78_v22, %v75_v28 }
  0x4b   :  { %v90_v31 = vsel %vm89_vm1, %v87_v25, %v84_v29  ;;  %v91_v32 = vadd.f32 %v81_v30, %v63_v24 }
  0x4c   :  { %v92_v33 = vadd.f32 %v90_v31, %v64_v27 }
  0x4e   :  { %v94_v34 = vadd.f32 %v92_v33, %v91_v32 }
  0x50   :  { %101 = vadd.xlane.f32.xlu0 %v94_v34 }
  0xdd   :  { %v102_v35 = vpop.xlane.xlu0 %101 }
  0xde   :  { %v103_v36 = vrot.slane %v102_v35, 4 }
  0xe0   :  { %v104_v37 = vadd.f32 %v103_v36, %v102_v35 }
  0xe2   :  { %v105_v38 = vrot.slane %v104_v37, 2 }
  0xe4   :  { %v106_v39 = vadd.f32 %v105_v38, %v104_v37 }
  0xe6   :  { %v107_v40 = vrot.slane %v106_v39, 1 }
  0xe8   :  { %v108_v41 = vadd.f32 %v107_v40, %v106_v39 }
  0xea   :  { %129 = vpush %v108_v41 }
 0x11b   :  { %s130_s7 = spop %129 }
 0x11c   :  { %v110_v42 = vstv %s130_s7 }
 0x11d   :  { %112 = vst.msk [vmem:[#allocation8] sm:$0x1] %vm111_vm2, %v110_v42 }
 0x11e   :  { %199 = shalt.err (!%p196_p6)
}
 0x11f   :  { %s200_s12 = scalar_lea.hbm %s274_s2, 16 }
 0x120   :  { %p201_p7 = scmp.ne.s32.totalorder %s274_s2, %s200_s12  ;;  %p204_p8 = scmp.lt.u32.totalorder %s200_s12, %s274_s2 }
 0x122   :  { %p206_p9 = pnand %p204_p8, %p201_p7 }
 0x124   :  { %209 = shalt.err (!%p206_p9)
}
 0x125   :  { %122 = dma.vmem_to_hbm [thread:$0]  %s120_s6, 16, %s274_s2, [#allocation5]  }
 0x126   :  { %214 = dma.done.wait [#allocation5], 16  }
 0x127   :  { %215 = vsyncadd [#allocation5], 4294967280 }
 0x128   :  { %126 = vsyncpa [#allocation4], 1 }
 0x129   :  { %127 = vsyncpa [#allocation7], 1 }
 0x12a   :  { %128 = vsyncpa [#allocation5], 1 }

</bundles_post_ra>
